<compile_context>
chip_gen: v5e
topology: v5e:2x2
jax: 0.10.0
libtpu: 0.0.40
codegen_flags: <defaults>
</compile_context>

<pallas_src>
import jax
import jax.numpy as jnp
from jax.experimental import pallas as pl
from jax.experimental.pallas import tpu as pltpu


def _spatial_dropout_kernel(x_ref, m_ref, o_ref):
    # x_ref, o_ref: (1, TS, E) tiles; m_ref: (1, 1, E) per-row mask.
    # Broadcast multiply in the native dtype (single VPU pass over the tile).
    o_ref[...] = x_ref[...] * m_ref[...]


def _choose_seq_tile(S: int, E: int, dtype) -> int:
    """Pick a sequence-tile size: sublane-aligned, VMEM-budget aware."""
    itemsize = jnp.dtype(dtype).itemsize
    # sublane alignment: 8 for 4-byte, 16 for 2-byte, 32 for 1-byte dtypes
    align = max(8, 32 // max(itemsize, 1))
    # double-buffered input + output tiles -> ~4 * TS * E * itemsize bytes;
    # stay well under the default scoped VMEM limit (and v7x's 64 MiB).
    budget_bytes = 24 * 1024 * 1024
    max_ts = max(align, budget_bytes // (4 * E * itemsize))
    ts = min(S, 512, max_ts)
    if ts >= S:
        return S  # full-extent block is always legal
    return max(align, (ts // align) * align)


def spatial_dropout(x, drop_prob: float, seed: int, *, training: bool = True):
    """JAX/Pallas equivalent of SpatialDropout.forward for x of shape (B, S, E)."""
    if (not training) or drop_prob == 0.0:
        return x
    if drop_prob == 1.0:
        # noise.fill_(0) path: everything is dropped.
        return jnp.zeros_like(x)

    B, S, E = x.shape
    p = float(drop_prob)
    scale = 1.0 / (1.0 - p)

    # Per-(batch, channel) keep mask, already scaled by 1/(1-p); constant over S.
    key = jax.random.PRNGKey(seed)
    keep = jax.random.bernoulli(key, 1.0 - p, (B, 1, E))
    mask = (keep.astype(jnp.float32) * jnp.float32(scale)).astype(x.dtype)

    ts = _choose_seq_tile(S, E, x.dtype)
    grid = (B, pl.cdiv(S, ts))

    return pl.pallas_call(
        _spatial_dropout_kernel,
        out_shape=jax.ShapeDtypeStruct((B, S, E), x.dtype),
        grid=grid,
        in_specs=[
            pl.BlockSpec((1, ts, E), lambda b, s: (b, s, 0)),   # x tile
            pl.BlockSpec((1, 1, E), lambda b, s: (b, 0, 0)),    # per-row mask
        ],
        out_specs=pl.BlockSpec((1, ts, E), lambda b, s: (b, s, 0)),
        compiler_params=pltpu.CompilerParams(
            dimension_semantics=("parallel", "parallel"),
        ),
    )(x, mask)


if __name__ == "__main__":
    key = jax.random.PRNGKey(0)
    B, S, E = 2, 8, 128
    x = jax.random.normal(key, (B, S, E), dtype=jnp.float32)

    drop_prob = 0.3
    out = spatial_dropout(x, drop_prob, seed=42, training=True)
    out = jax.block_until_ready(out)

    # Sanity checks mirroring SpatialDropout semantics:
    # 1) mask is constant along the sequence axis for each (batch, channel)
    ratio = jnp.where(jnp.abs(x) > 1e-6, out / x, jnp.nan)
    ref_row = ratio[:, 0:1, :]
    same_across_seq = jnp.nanmax(jnp.abs(ratio - ref_row)) < 1e-5
    # 2) surviving channels are scaled by 1/(1-p), dropped channels are 0
    vals = ratio[~jnp.isnan(ratio)]
    scale = 1.0 / (1.0 - drop_prob)
    valid_values = jnp.all(
        (jnp.abs(vals) < 1e-5) | (jnp.abs(vals - scale) < 1e-4)
    )
    # 3) eval mode / p=0 is identity
    identity_ok = jnp.array_equal(
        spatial_dropout(x, drop_prob, 0, training=False), x
    )
    # 4) p=1 drops everything
    all_dropped = jnp.all(spatial_dropout(x, 1.0, 0, training=True) == 0)

    assert bool(same_across_seq), "mask not constant over sequence axis"
    assert bool(valid_values), "mask values not in {0, 1/(1-p)}"
    assert bool(identity_ok), "eval-mode passthrough failed"
    assert bool(all_dropped), "p=1 path failed"

    print("KERNEL_OK")
</pallas_src>

<mosaic_0001>
module attributes {stable_mosaic.version = 11 : i64} {
  func.func @_spatial_dropout_kernel(%arg0: i32, %arg1: i32, %arg2: memref<1x8x128xf32, #tpu.memory_space<vmem>>, %arg3: memref<1x1x128xf32, #tpu.memory_space<vmem>>, %arg4: memref<1x8x128xf32, #tpu.memory_space<vmem>>) attributes {dimension_semantics = [#tpu.dimension_semantics<parallel>, #tpu.dimension_semantics<parallel>], iteration_bounds = array<i64: 2, 1>, scalar_prefetch = 0 : i64, scratch_operands = 0 : i64, tpu.core_type = #tpu.core_type<tc>, window_params = [{transform_indices = @transform_0, window_bounds = array<i64: 1, 8, 128>}, {transform_indices = @transform_1, window_bounds = array<i64: 1, 1, 128>}, {transform_indices = @transform_2, window_bounds = array<i64: 1, 8, 128>}]} {
    %c0 = arith.constant 0 : index
    %c0_0 = arith.constant 0 : index
    %c0_1 = arith.constant 0 : index
    %0 = vector.load %arg2[%c0, %c0_0, %c0_1] : memref<1x8x128xf32, #tpu.memory_space<vmem>>, vector<1x8x128xf32>
    %c0_2 = arith.constant 0 : index
    %c0_3 = arith.constant 0 : index
    %c0_4 = arith.constant 0 : index
    %1 = vector.load %arg3[%c0_2, %c0_3, %c0_4] : memref<1x1x128xf32, #tpu.memory_space<vmem>>, vector<1x1x128xf32>
    %2 = vector.broadcast %1 : vector<1x1x128xf32> to vector<1x8x128xf32>
    %3 = arith.mulf %0, %2 : vector<1x8x128xf32>
    %c0_5 = arith.constant 0 : index
    %c0_6 = arith.constant 0 : index
    %c0_7 = arith.constant 0 : index
    %4 = vector.load %arg4[%c0_5, %c0_6, %c0_7] : memref<1x8x128xf32, #tpu.memory_space<vmem>>, vector<1x8x128xf32>
    tpu.vector_store %arg4[%c0_5, %c0_6, %c0_7], %3 {strides = array<i32>} : memref<1x8x128xf32, #tpu.memory_space<vmem>>, vector<1x8x128xf32>,
    return
  }
  func.func @transform_0(%arg0: i32, %arg1: i32) -> (i32, i32, i32) {
    %c0_i32 = arith.constant 0 : i32
    %c0_i32_0 = arith.constant 0 : i32
    return %arg0, %arg1, %c0_i32 : i32, i32, i32
  }
  func.func @transform_1(%arg0: i32, %arg1: i32) -> (i32, i32, i32) {
    %c0_i32 = arith.constant 0 : i32
    %c0_i32_0 = arith.constant 0 : i32
    %c0_i32_1 = arith.constant 0 : i32
    return %arg0, %c0_i32, %c0_i32_0 : i32, i32, i32
  }
  func.func @transform_2(%arg0: i32, %arg1: i32) -> (i32, i32, i32) {
    %c0_i32 = arith.constant 0 : i32
    %c0_i32_0 = arith.constant 0 : i32
    return %arg0, %arg1, %c0_i32 : i32, i32, i32
  }
}

</mosaic_0001>

<bundles_post_ra>
// kernel: tpu_custom_call.1
= control target key start
LH: loop header
LB: loop body
LE: loop exit
PB: predicated region body
PF: predicated region fallthrough
CT: control target
= control target key end

     0   :  { %7 = vsyncpa [#allocation3], 0  ;;  %s710_s0 = inlined_call_operand.hbm [shape: f32[2,8,128], index: 0, kind: input, shape index: {}]   ;;  %s711_s1 = inlined_call_operand.hbm [shape: f32[2,1,128], index: 1, kind: input, shape index: {}]   ;;  %s712_s2 = inlined_call_operand.hbm [shape: f32[2,8,128], index: 2, kind: output, shape index: {}]  }
   0x1   :  { %9 = vsyncpa [#allocation3 + $0x1], 0 }
   0x2   :  { %10 = vsyncpa [#allocation6], 0 }
   0x3   :  { %12 = vsyncpa [#allocation6 + $0x1], 0 }
   0x4   :  { %13 = vsyncpa [#allocation4], 0 }
   0x5   :  { %15 = vsyncpa [#allocation4 + $0x1], 0  ;;  %s580_s9 = smov 0   ;;  %s582_s10 = smov 0  }
   0x6   :  { %s584_s11 = smov 0   ;;  %s586_s12 = smov 0  }
   0x7   :  { %s588_s13 = smov 0   ;;  %s590_s14 = smov 0  }
   0x8 LB: > { %s336_s15 = sadd.s32 4294967295, %s563_s14   ;;  %s337_s16 = sadd.s32 4294967294, %s563_s14   ;;  %s563_s14 = sphi %s590_s14, %s21_s14   ;;  %s559_s13 = sphi %s588_s13, %s721_s13   ;;  %s555_s12 = sphi %s586_s12, %s720_s12   ;;  %s551_s11 = sphi %s584_s11, %s719_s11   ;;  %s547_s10 = sphi %s582_s10, %s718_s10   ;;  %s543_s9 = sphi %s580_s9, %s717_s9  }
   0x9   : > { %s33_s17 = sadd.s32 1, %s559_s13  ;;  %s42_s18 = sadd.s32 1, %s551_s11 }
   0xa   : > { %p35_p0 = scmp.ge.s32.totalorder %s33_s17, 2  ;;  %p49_p1 = scmp.ne.s32.totalorder %s551_s11, %s547_s10 }
   0xb   : > { %p50_p2 = scmp.eq.s32.totalorder %s563_s14, 0  ;;  %p55_p3 = scmp.ne.s32.totalorder %s547_s10, %s543_s9 }
   0xc   : > { %s723_s17 = smov (%p35_p0, %s33_s17), 0  ;;  %p56_p5 = scmp.eq.s32.totalorder %s336_s15, 0 }
   0xd   : > { %p621_p4 = por %p50_p2, %p49_p1  ;;  %s37_s20 = ssub.s32 %s559_s13, %s723_s17 }
   0xe   : > { %p107_p6 = scmp.eq.s32.totalorder %s336_s15, 1  ;;  %p40_p7 = scmp.eq.s32.totalorder %s37_s20, 0 }
   0xf   : > { %p627_p8 = por %p56_p5, %p55_p3  ;;  %p113_p10 = scmp.eq.s32.totalorder %s337_s16, 1 }
  0x10   : > { %p631_p9 = por %p107_p6, %p49_p1  ;;  %p339_p12 = scmp.ge.s32.totalorder %s563_s14, 2 }
  0x11   : > { %s636_s23 = scalar_select %p40_p7, %s551_s11, %s42_s18  }
  0x12   : > { %p638_p11 = por %p113_p10, %p55_p3  ;;  %p366_p13 = scmp.lt.s32.totalorder %s563_s14, 2 }
  0x13   : > { %s133_s25 = sand.u32 1, %s551_s11   ;;  %s341_s27 = sshll.u32 %s559_s13, 3 }
  0x14   : > { %s340_s26 = sshll.u32 %s133_s25, 3  ;;  %s142_s30 = scalar_lea.hbm %s710_s0, %s341_s27 }
  0x15   : > { %s137_s3 = scalar_lea.vmem [#allocation2], %s340_s26  ;;  %s144_s5 = sshll.u32 %s142_s30, 4  ;;  %s145_s5 = int_to_ptr.hbm [resolvable:$true] %s144_s5 }
  0x16   : > { %s146_s4 = sshll.u32 %s137_s3, 4  ;;  %p356_p0 = pnand %p366_p13, %p621_p4  ;;  %s147_s4 = int_to_ptr.vmem [resolvable:$true] %s146_s4 }
  0x17   : > { %p342_p1 = scmp.ge.s32.totalorder %s563_s14, 1  ;;  %p168_p2 = scmp.lt.s32.totalorder %s563_s14, 3 }
  0x18   : > { %s134_s6 = scalar_lea.sflag [#allocation3], %s133_s25  ;;  %s159_s15 = scalar_lea.hbm %s711_s1, %s559_s13 }
  0x19   : > { %358 = dma.hbm_to_vmem [thread:$0]  (!%p356_p0), %s145_s5, 128, %s147_s4, %s134_s6  }
  0x1a   : > { %p169_p3 = pnand %p342_p1, %p168_p2  ;;  %s156_s16 = scalar_lea.vmem [#allocation5], %s133_s25 }
  0x1b   : > { %s163_s18 = sshll.u32 %s156_s16, 4  ;;  %s161_s20 = sshll.u32 %s159_s15, 4  ;;  %s164_s18 = int_to_ptr.vmem [resolvable:$true] %s163_s18  ;;  %s162_s20 = int_to_ptr.hbm [resolvable:$true] %s161_s20 }
  0x1c   : > { %s154_s26 = scalar_lea.sflag [#allocation6], %s133_s25  ;;  %172 = sbr.rel (%p169_p3) target bundleno = 51 (0x33), region = 28 }
  0x1d   : > { %361 = dma.hbm_to_vmem [thread:$0]  (!%p356_p0), %s162_s20, 16, %s164_s18, %s154_s26  }
  0x1e   : > { %s658_s19 = sand.u32 (!%p169_p3), 1, %s547_s10  }
  0x1f   : > { %s343_s27 = sshll.u32 (!%p169_p3), %s658_s19, 3  ;;  %s175_s28 = scalar_lea.sflag (!%p169_p3), [#allocation3], %s658_s19 }
  0x20   : > { %s178_s29 = scalar_lea.vmem (!%p169_p3), [#allocation2], %s343_s27 }
  0x21   : > { %530 = dma.done.wait (%p627_p8), %s175_s28, 128  }
  0x22   : > { %532 = vsyncadd (%p627_p8), %s175_s28, 4294967168  ;;  %s185_s25 = scalar_lea.sflag [#allocation6], %s658_s19  ;;  %s187_s30 = scalar_lea.vmem [#allocation5], %s658_s19 }
  0x23   : > { %534 = dma.done.wait (%p627_p8), %s185_s25, 16  }
  0x24   : > { %536 = vsyncadd (%p627_p8), %s185_s25, 4294967280  ;;  %s346_s3 = sshll.u32 %s555_s12, 3  ;;  %s212_s7 = scalar_lea.vmem [#allocation7], %s343_s27  ;;  %v213_v0 = vld [vmem:[%s178_s29] sm:$0xff] }
  0x25   : > { %s232_s6 = scalar_lea.hbm %s712_s2, %s346_s3  ;;  %s234_s8 = sshll.u32 %s212_s7, 4  ;;  %v416_v1 = vld [vmem:[%s187_s30] ss:$0 sm:$0xff]  ;;  %s235_s8 = int_to_ptr.vmem [resolvable:$true] %s234_s8 }
  0x26   : > { %s236_s15 = sshll.u32 %s232_s6, 4  ;;  %v218_v2 = vmul.f32 %v416_v1, %v213_v0  ;;  %s221_s16 = scalar_lea.sflag [#allocation4], %s658_s19  ;;  %s237_s15 = int_to_ptr.hbm [resolvable:$true] %s236_s15 }
  0x27   : > { %s491_s21 = sshra.s32 %s237_s15, 4  ;;  %s497_s26 = scalar_lea.hbm %s712_s2, 16  ;;  %s492_s21 = int_to_ptr.hbm [resolvable:$true] %s491_s21 }
  0x28   : > { %219 = vst [vmem:[%s212_s7] sm:$0xff] %v218_v2  ;;  %s493_s18 = scalar_lea.hbm %s492_s21, 8  ;;  %p498_p7 = scmp.lt.s32.totalorder %s492_s21, %s712_s2 }
  0x29   : > { %p494_p4 = scmp.ne.s32.totalorder %s492_s21, %s493_s18  ;;  %p499_p8 = scmp.lt.s32.totalorder %s497_s26, %s493_s18 }
  0x2b   : > { %p495_p5 = pnand %p494_p4, %p631_p9  ;;  %p500_p10 = por %p499_p8, %p498_p7 }
  0x2d   : > { %p496_p6 = pneg %p495_p5 }
  0x2f   : > { %p501_p13 = pnand %p500_p10, %p496_p6 }
  0x31   : > { %504 = shalt.err (!%p501_p13)
}
  0x32   : > { %353 = dma.vmem_to_hbm [thread:$0]  (%p631_p9), %s235_s8, 128, %s237_s15, %s221_s16  }
  0x33 PF: > { %s248_s19 = sand.u32 1, %s543_s9   ;;  %p363_p0 = pnand %p339_p12, %p638_p11 }
  0x34   : > { %s249_s29 = scalar_lea.sflag [#allocation4], %s248_s19 }
  0x35   : > { %p364_p1 = pneg %p363_p0 }
  0x37   : > { %538 = dma.done.wait (%p364_p1), %s249_s29, 128  }
  0x38   : > { %540 = vsyncadd (%p364_p1), %s249_s29, 4294967168  ;;  %s21_s14 = sadd.s32 1, %s563_s14   ;;  %s717_s9 = smov %s547_s10 }
  0x39   : > { %p18_p2 = scmp.ge.s32.totalorder %s21_s14, 4   ;;  %s718_s10 = smov %s551_s11 }
  0x3a   : > { %s719_s11 = smov %s636_s23  ;;  %s720_s12 = smov %s559_s13 }
  0x3b   : > { %s721_s13 = smov %s723_s17  ;;  %20 = sbr.rel (!%p18_p2) target bundleno = 8 (0x8), region = 86 }
  0x40   :  { %255 = vsyncpa [#allocation3], 1 }
  0x41   :  { %257 = vsyncpa [#allocation3 + $0x1], 1 }
  0x42   :  { %258 = vsyncpa [#allocation6], 1 }
  0x43   :  { %260 = vsyncpa [#allocation6 + $0x1], 1 }
  0x44   :  { %261 = vsyncpa [#allocation4], 1 }
  0x45   :  { %263 = vsyncpa [#allocation4 + $0x1], 1 }

</bundles_post_ra>
